<compile_context>
chip_gen: v7x
topology: tpu7x:2x2x1
jax: 0.10.0
libtpu: 0.0.40
codegen_flags: <defaults>
</compile_context>

<pallas_src>
import jax
import jax.numpy as jnp
from jax.experimental import pallas as pl
from jax.experimental.pallas import tpu as pltpu  # noqa: F401  (TPU backend)


def _lstm_cell_kernel(prev_c_ref, prev_h_ref, x_ref, w_ref, gates_ref, state_ref):
    """One peepholed-LSTM step, fully fused.

    prev_c_ref, prev_h_ref: (B, H)
    x_ref:                  (B, I)
    w_ref:                  (2H + I, 4H) fused gate weights, columns [f|i|o|c~]
    gates_ref:              (B, 4H) packed [f | i | o | c_tilde]
    state_ref:              (B, 2H) packed [next_h | next_c]
    """
    H = prev_c_ref.shape[1]

    prev_c = prev_c_ref[...]
    prev_h = prev_h_ref[...]
    x = x_ref[...]

    # Single fused matmul over the (virtual) concat axis, expressed as three
    # row-block matmuls against the resident fused weight (f32 accumulation).
    acc = jnp.dot(prev_c, w_ref[0:H, :], preferred_element_type=jnp.float32)
    acc = acc + jnp.dot(prev_h, w_ref[H:2 * H, :],
                        preferred_element_type=jnp.float32)
    acc = acc + jnp.dot(x, w_ref[2 * H:, :],
                        preferred_element_type=jnp.float32)

    # Lanes [0:3H] are sigmoid gates (f, i, o); lanes [3H:4H] are tanh (c~).
    lane = jax.lax.broadcasted_iota(jnp.int32, acc.shape, 1)
    gates = jnp.where(lane < 3 * H, jax.nn.sigmoid(acc), jnp.tanh(acc))

    f = gates[:, 0:H]
    i = gates[:, H:2 * H]
    o = gates[:, 2 * H:3 * H]
    c_tilde = gates[:, 3 * H:4 * H]

    next_c = f * prev_c + i * c_tilde
    next_h = o * jnp.tanh(next_c)

    # Lane-dense packed stores.
    gates_ref[...] = gates.astype(gates_ref.dtype)
    state_ref[...] = jnp.concatenate([next_h, next_c], axis=1).astype(state_ref.dtype)


def peepholed_lstm_cell(x, prev_state, W_f, W_i, W_c, W_o, hidden_size):
    """JAX wrapper mirroring VisualizePeepholedLSTMCell.forward.

    x:          (B, input_size) float32
    prev_state: None or (prev_h, prev_c), each (B, hidden_size)
    W_*:        (hidden_size, 2*hidden_size + input_size)  (PyTorch layout)

    Returns (next_h, next_c, (f, i, o, c_tilde)).
    """
    batch = x.shape[0]
    if prev_state is None:
        prev_h = jnp.zeros((batch, hidden_size), dtype=x.dtype)
        prev_c = jnp.zeros((batch, hidden_size), dtype=x.dtype)
    else:
        prev_h, prev_c = prev_state

    B = batch
    H = hidden_size
    I = x.shape[1]
    K = 2 * H + I

    # Fuse the four gate weights into one (K, 4H) matrix, columns [f|i|o|c~].
    # Rows [0:H] pair with prev_c, [H:2H] with prev_h, [2H:] with x, matching
    # torch.cat((prev_c, prev_h, x), dim=1) @ W.T.
    w_fused = jnp.concatenate([W_f.T, W_i.T, W_o.T, W_c.T], axis=1)

    full = lambda shape: pl.BlockSpec(shape, lambda: (0,) * len(shape))

    gates, state = pl.pallas_call(
        _lstm_cell_kernel,
        out_shape=(
            jax.ShapeDtypeStruct((B, 4 * H), jnp.float32),
            jax.ShapeDtypeStruct((B, 2 * H), jnp.float32),
        ),
        in_specs=[
            full((B, H)),       # prev_c
            full((B, H)),       # prev_h
            full((B, I)),       # x
            full((K, 4 * H)),   # fused weights
        ],
        out_specs=(full((B, 4 * H)), full((B, 2 * H))),
    )(prev_c, prev_h, x, w_fused)

    f = gates[:, 0:H]
    i = gates[:, H:2 * H]
    o = gates[:, 2 * H:3 * H]
    c_tilde = gates[:, 3 * H:]
    next_h = state[:, :H]
    next_c = state[:, H:]
    return next_h, next_c, (f, i, o, c_tilde)


def _reference(x, prev_state, W_f, W_i, W_c, W_o, hidden_size):
    """Pure-JAX reference of the PyTorch forward, for verification."""
    batch = x.shape[0]
    if prev_state is None:
        prev_h = jnp.zeros((batch, hidden_size), dtype=x.dtype)
        prev_c = jnp.zeros((batch, hidden_size), dtype=x.dtype)
    else:
        prev_h, prev_c = prev_state
    z = jnp.concatenate((prev_c, prev_h, x), axis=1)
    f = jax.nn.sigmoid(z @ W_f.T)
    i = jax.nn.sigmoid(z @ W_i.T)
    o = jax.nn.sigmoid(z @ W_o.T)
    c_tilde = jnp.tanh(z @ W_c.T)
    next_c = f * prev_c + i * c_tilde
    next_h = o * jnp.tanh(next_c)
    return next_h, next_c, (f, i, o, c_tilde)


if __name__ == "__main__":
    batch = 8
    input_size = 32
    hidden_size = 32
    concat_dim = 2 * hidden_size + input_size

    key = jax.random.PRNGKey(0)
    k_x, k_h, k_c, k_f, k_i, k_cc, k_o = jax.random.split(key, 7)

    # reset_parameters: uniform(-sqrt_k, sqrt_k), sqrt_k = 1/sqrt(hidden_size)
    sqrt_k = (1.0 / hidden_size) ** 0.5
    uinit = lambda k: jax.random.uniform(
        k, (hidden_size, concat_dim), jnp.float32, minval=-sqrt_k, maxval=sqrt_k)
    W_f = uinit(k_f)
    W_i = uinit(k_i)
    W_c = uinit(k_cc)
    W_o = uinit(k_o)

    x = jax.random.normal(k_x, (batch, input_size), jnp.float32)
    prev_h = jax.random.normal(k_h, (batch, hidden_size), jnp.float32)
    prev_c = jax.random.normal(k_c, (batch, hidden_size), jnp.float32)

    next_h, next_c, (f, i, o, c_tilde) = peepholed_lstm_cell(
        x, (prev_h, prev_c), W_f, W_i, W_c, W_o, hidden_size)
    jax.block_until_ready((next_h, next_c, f, i, o, c_tilde))

    # Verify against the pure-JAX reference.
    rh, rc, (rf, ri, ro, rct) = _reference(
        x, (prev_h, prev_c), W_f, W_i, W_c, W_o, hidden_size)
    for got, want in [(next_h, rh), (next_c, rc), (f, rf), (i, ri),
                      (o, ro), (c_tilde, rct)]:
        assert jnp.allclose(got, want, atol=1e-5, rtol=1e-5), "mismatch vs reference"

    # Also exercise the prev_state=None path once.
    h0, c0, (f0, i0, o0, ct0) = peepholed_lstm_cell(
        x, None, W_f, W_i, W_c, W_o, hidden_size)
    jax.block_until_ready((h0, c0))
    rh0, rc0, _ = _reference(x, None, W_f, W_i, W_c, W_o, hidden_size)
    assert jnp.allclose(h0, rh0, atol=1e-5, rtol=1e-5)
    assert jnp.allclose(c0, rc0, atol=1e-5, rtol=1e-5)

    print("KERNEL_OK")
</pallas_src>

<mosaic_0001>
module attributes {stable_mosaic.version = 11 : i64} {
  func.func @_lstm_cell_kernel(%arg0: memref<8x32xf32, #tpu.memory_space<vmem>>, %arg1: memref<8x32xf32, #tpu.memory_space<vmem>>, %arg2: memref<8x32xf32, #tpu.memory_space<vmem>>, %arg3: memref<96x128xf32, #tpu.memory_space<vmem>>, %arg4: memref<8x128xf32, #tpu.memory_space<vmem>>, %arg5: memref<8x64xf32, #tpu.memory_space<vmem>>) attributes {dimension_semantics = [], scalar_prefetch = 0 : i64, scratch_operands = 0 : i64, tpu.core_type = #tpu.core_type<tc>} {
    %c0 = arith.constant 0 : index
    %c0_0 = arith.constant 0 : index
    %0 = vector.load %arg0[%c0, %c0_0] : memref<8x32xf32, #tpu.memory_space<vmem>>, vector<8x32xf32>
    %c0_1 = arith.constant 0 : index
    %c0_2 = arith.constant 0 : index
    %1 = vector.load %arg1[%c0_1, %c0_2] : memref<8x32xf32, #tpu.memory_space<vmem>>, vector<8x32xf32>
    %c0_3 = arith.constant 0 : index
    %c0_4 = arith.constant 0 : index
    %2 = vector.load %arg2[%c0_3, %c0_4] : memref<8x32xf32, #tpu.memory_space<vmem>>, vector<8x32xf32>
    %c0_5 = arith.constant 0 : index
    %c0_6 = arith.constant 0 : index
    %3 = vector.load %arg3[%c0_5, %c0_6] : memref<96x128xf32, #tpu.memory_space<vmem>>, vector<32x128xf32>
    %cst = arith.constant dense<0.000000e+00> : vector<8x128xf32>
    %4 = tpu.matmul %0, %3, %cst {dimension_numbers = #tpu.dot_dimension_numbers<[1], [0], [0], [1], [0, 0, 1, 1], [], []>} : vector<8x32xf32>, vector<32x128xf32>, vector<8x128xf32> -> vector<8x128xf32>
    %c32 = arith.constant 32 : index
    %c0_7 = arith.constant 0 : index
    %5 = vector.load %arg3[%c32, %c0_7] : memref<96x128xf32, #tpu.memory_space<vmem>>, vector<32x128xf32>
    %cst_8 = arith.constant dense<0.000000e+00> : vector<8x128xf32>
    %6 = tpu.matmul %1, %5, %cst_8 {dimension_numbers = #tpu.dot_dimension_numbers<[1], [0], [0], [1], [0, 0, 1, 1], [], []>} : vector<8x32xf32>, vector<32x128xf32>, vector<8x128xf32> -> vector<8x128xf32>
    %7 = arith.addf %4, %6 : vector<8x128xf32>
    %c64 = arith.constant 64 : index
    %c0_9 = arith.constant 0 : index
    %8 = vector.load %arg3[%c64, %c0_9] : memref<96x128xf32, #tpu.memory_space<vmem>>, vector<32x128xf32>
    %cst_10 = arith.constant dense<0.000000e+00> : vector<8x128xf32>
    %9 = tpu.matmul %2, %8, %cst_10 {dimension_numbers = #tpu.dot_dimension_numbers<[1], [0], [0], [1], [0, 0, 1, 1], [], []>} : vector<8x32xf32>, vector<32x128xf32>, vector<8x128xf32> -> vector<8x128xf32>
    %10 = arith.addf %7, %9 : vector<8x128xf32>
    %11 = tpu.iota {dimensions = array<i32: 1>} : vector<8x128xi32>
    %c96_i32 = arith.constant 96 : i32
    %12 = vector.broadcast %c96_i32 : i32 to vector<8x128xi32>
    %13 = arith.cmpi slt, %11, %12 : vector<8x128xi32>
    %14 = arith.negf %10 : vector<8x128xf32>
    %15 = math.exp %14 : vector<8x128xf32>
    %cst_11 = arith.constant 1.000000e+00 : f32
    %16 = vector.broadcast %cst_11 : f32 to vector<8x128xf32>
    %17 = arith.addf %16, %15 : vector<8x128xf32>
    %18 = arith.divf %16, %17 : vector<8x128xf32>
    %19 = math.tanh %10 : vector<8x128xf32>
    %20 = arith.select %13, %18, %19 : vector<8x128xi1>, vector<8x128xf32>
    %21 = vector.extract_strided_slice %20 {offsets = [0, 0], sizes = [8, 32], strides = [1, 1]} : vector<8x128xf32> to vector<8x32xf32>
    %22 = vector.extract_strided_slice %20 {offsets = [0, 32], sizes = [8, 32], strides = [1, 1]} : vector<8x128xf32> to vector<8x32xf32>
    %23 = vector.extract_strided_slice %20 {offsets = [0, 64], sizes = [8, 32], strides = [1, 1]} : vector<8x128xf32> to vector<8x32xf32>
    %24 = vector.extract_strided_slice %20 {offsets = [0, 96], sizes = [8, 32], strides = [1, 1]} : vector<8x128xf32> to vector<8x32xf32>
    %25 = arith.mulf %21, %0 : vector<8x32xf32>
    %26 = arith.mulf %22, %24 : vector<8x32xf32>
    %27 = arith.addf %25, %26 : vector<8x32xf32>
    %28 = math.tanh %27 : vector<8x32xf32>
    %29 = arith.mulf %23, %28 : vector<8x32xf32>
    %c0_12 = arith.constant 0 : index
    %c0_13 = arith.constant 0 : index
    %30 = vector.load %arg4[%c0_12, %c0_13] : memref<8x128xf32, #tpu.memory_space<vmem>>, vector<8x128xf32>
    tpu.vector_store %arg4[%c0_12, %c0_13], %20 {strides = array<i32>} : memref<8x128xf32, #tpu.memory_space<vmem>>, vector<8x128xf32>,
    %31 = tpu.concatenate %29, %27 in 1 : vector<8x32xf32>, vector<8x32xf32> -> vector<8x64xf32>
    %c0_14 = arith.constant 0 : index
    %c0_15 = arith.constant 0 : index
    %32 = vector.load %arg5[%c0_14, %c0_15] : memref<8x64xf32, #tpu.memory_space<vmem>>, vector<8x64xf32>
    tpu.vector_store %arg5[%c0_14, %c0_15], %31 {strides = array<i32>} : memref<8x64xf32, #tpu.memory_space<vmem>>, vector<8x64xf32>,
    return
  }
}

</mosaic_0001>

<bundles_post_ra>
// kernel: tpu_custom_call.1
= control target key start
LH: loop header
LB: loop body
LE: loop exit
PB: predicated region body
PF: predicated region fallthrough
CT: control target
= control target key end

     0   :  { %11 = vsyncpa [#allocation3], 0  ;;  %s747_s0 = inlined_call_operand.hbm [shape: f32[8,32], index: 0, kind: input, shape index: {}]   ;;  %s748_s1 = inlined_call_operand.hbm [shape: f32[8,32], index: 1, kind: input, shape index: {}]   ;;  %s749_s2 = inlined_call_operand.hbm [shape: f32[8,32], index: 2, kind: input, shape index: {}]   ;;  %s750_s3 = inlined_call_operand.hbm [shape: f32[96,128], index: 3, kind: input, shape index: {}]   ;;  %s751_s4 = inlined_call_operand.hbm [shape: f32[8,128], index: 4, kind: output, shape index: {0}]   ;;  %s752_s5 = inlined_call_operand.hbm [shape: f32[8,64], index: 5, kind: output, shape index: {1}]  }
   0x1   :  { %12 = vsyncpa [#allocation6], 0 }
   0x2   :  { %13 = vsyncpa [#allocation9], 0 }
   0x3   :  { %14 = vsyncpa [#allocation4], 0 }
   0x4   :  { %15 = vsyncpa [#allocation12], 0  ;;  %s614_s18 = smov [#allocation5]   ;;  %s615_s20 = smov [#allocation2]  }
   0x5   :  { %s32_s19 = sshll.u32 %s614_s18, 4  ;;  %s22_s21 = sshll.u32 %s615_s20, 4  ;;  %s33_s19 = int_to_ptr.vmem [resolvable:$true] %s32_s19  ;;  %s23_s21 = int_to_ptr.vmem [resolvable:$true] %s22_s21 }
   0x6   :  { %s472_s24 = scalar_lea.hbm %s748_s1, 128 }
   0x7   :  { %p473_p0 = scmp.ne.s32.totalorder %s748_s1, %s472_s24  ;;  %p476_p1 = scmp.lt.u32.totalorder %s472_s24, %s748_s1 }
   0x9   :  { %p478_p2 = pnand %p476_p1, %p473_p0 }
   0xb   :  { %481 = shalt.err (!%p478_p2)
}
   0xc   :  { %s482_s29 = scalar_lea.vmem %s33_s19, 128  ;;  %p487_p4 = scmp.lt.s32.totalorder %s33_s19, %s33_s19 }
   0xd   :  { %p483_p3 = scmp.ne.s32.totalorder %s33_s19, %s482_s29  ;;  %p488_p5 = scmp.lt.s32.totalorder %s482_s29, %s482_s29 }
   0xf   :  { %p489_p6 = por %p488_p5, %p487_p4 }
  0x11   :  { %p490_p7 = pnand %p489_p6, %p483_p3 }
  0x13   :  { %493 = shalt.err (!%p490_p7)
}
  0x14   :  { %35 = dma.hbm_to_vmem [thread:$0]  %s748_s1, 128, %s33_s19, [#allocation6]  }
  0x15   :  { %s494_s9 = scalar_lea.hbm %s747_s0, 128 }
  0x16   :  { %p495_p8 = scmp.ne.s32.totalorder %s747_s0, %s494_s9  ;;  %p498_p9 = scmp.lt.u32.totalorder %s494_s9, %s747_s0 }
  0x18   :  { %p500_p10 = pnand %p498_p9, %p495_p8 }
  0x1a   :  { %503 = shalt.err (!%p500_p10)
}
  0x1b   :  { %s504_s14 = scalar_lea.vmem %s23_s21, 128  ;;  %p509_p12 = scmp.lt.s32.totalorder %s23_s21, %s23_s21 }
  0x1c   :  { %p505_p11 = scmp.ne.s32.totalorder %s23_s21, %s504_s14  ;;  %p510_p13 = scmp.lt.s32.totalorder %s504_s14, %s504_s14 }
  0x1e   :  { %p511_p0 = por %p510_p13, %p509_p12 }
  0x20   :  { %p512_p1 = pnand %p511_p0, %p505_p11 }
  0x22   :  { %515 = shalt.err (!%p512_p1)
}
  0x23   :  { %25 = dma.hbm_to_vmem [thread:$0]  %s747_s0, 128, %s23_s21, [#allocation3]  }
  0x24   :  { %s616_s16 = smov [#allocation7]   ;;  %s617_s18 = smov [#allocation8]  }
  0x25   :  { %s42_s17 = sshll.u32 %s616_s16, 4  ;;  %s51_s19 = sshll.u32 %s617_s18, 4  ;;  %s43_s17 = int_to_ptr.vmem [resolvable:$true] %s42_s17  ;;  %s682_s19 = int_to_ptr.vmem [resolvable:$true] %s51_s19 }
  0x26   :  { %s516_s23 = scalar_lea.hbm %s749_s2, 128 }
  0x27   :  { %p517_p2 = scmp.ne.s32.totalorder %s749_s2, %s516_s23  ;;  %p520_p3 = scmp.lt.u32.totalorder %s516_s23, %s749_s2 }
  0x29   :  { %p522_p4 = pnand %p520_p3, %p517_p2 }
  0x2b   :  { %525 = shalt.err (!%p522_p4)
}
  0x2c   :  { %s526_s0 = scalar_lea.vmem %s43_s17, 128  ;;  %p531_p6 = scmp.lt.s32.totalorder %s43_s17, %s43_s17 }
  0x2d   :  { %p527_p5 = scmp.ne.s32.totalorder %s43_s17, %s526_s0  ;;  %p532_p7 = scmp.lt.s32.totalorder %s526_s0, %s526_s0 }
  0x2f   :  { %p533_p8 = por %p532_p7, %p531_p6 }
  0x31   :  { %p534_p9 = pnand %p533_p8, %p527_p5 }
  0x33   :  { %537 = shalt.err (!%p534_p9)
}
  0x34   :  { %45 = dma.hbm_to_vmem [thread:$0]  %s749_s2, 128, %s43_s17, [#allocation6]  }
  0x35   :  { %s538_s6 = scalar_lea.hbm %s750_s3, 1536 }
  0x36   :  { %p539_p10 = scmp.ne.s32.totalorder %s750_s3, %s538_s6  ;;  %p542_p11 = scmp.lt.u32.totalorder %s538_s6, %s750_s3 }
  0x38   :  { %p544_p12 = pnand %p542_p11, %p539_p10 }
  0x3a   :  { %547 = shalt.err (!%p544_p12)
}
  0x3b   :  { %s548_s11 = scalar_lea.vmem %s682_s19, 1536  ;;  %p553_p0 = scmp.lt.s32.totalorder %s682_s19, %s682_s19 }
  0x3c   :  { %p549_p13 = scmp.ne.s32.totalorder %s682_s19, %s548_s11  ;;  %p554_p1 = scmp.lt.s32.totalorder %s548_s11, %s548_s11 }
  0x3e   :  { %p555_p2 = por %p554_p1, %p553_p0 }
  0x40   :  { %p556_p3 = pnand %p555_p2, %p549_p13 }
  0x42   :  { %559 = shalt.err (!%p556_p3)
}
  0x43   :  { %s618_s2 = smov 128   ;;  %s619_s12 = smov 8  }
  0x44   :  { %57 = dma.hbm_to_vmem [thread:$0]  %s750_s3, 1536, %s682_s19, [#allocation9], %s618_s2, %s618_s2, %s619_s12  }
  0x45   :  { %604 = dma.done.wait [#allocation3], 128  }
  0x46   :  { %605 = vsyncadd [#allocation3], 4294967168 }
  0x47   :  { %606 = dma.done.wait [#allocation6], 256  }
  0x48   :  { %607 = vsyncadd [#allocation6], 4294967040 }
  0x49   :  { %608 = dma.done.wait [#allocation9], 1536  }
  0x4a   :  { %609 = vsyncadd [#allocation9], 4294965760  ;;  %v620_v0 = vmov 0.0|0.0   ;;  %vm621_vm0 = vmmov 0   ;;  %v622_v1 = vmov 0.0   ;;  %v73_v2 = vld [vmem:[#allocation8] sm:$0xff]  ;;  %v306_v31 = vlaneseq }
  0x4b   :  { %435 = vmatprep.subr.bf16.mxu0 %v620_v0  ;;  %415 = vmatprep.mubr.msk.f32.mxu0 %vm621_vm0, %v622_v1  ;;  %v74_v3 = vld [vmem:[#allocation8 + $0x8] sm:$0xff]  ;;  %v75_v4 = vld [vmem:[#allocation8 + $0x10] sm:$0xff]  ;;  %v76_v6 = vld [vmem:[#allocation8 + $0x18] sm:$0xff]  ;;  %vm81_vm1 = vcmask 261120   ;;  %s623_s3 = smov 64   ;;  %s624_s1 = smov 96  }
  0x4c   :  { %429 = vmatprep.subr.bf16.mxu1 %v620_v0  ;;  %404 = vmatprep.mubr.msk.f32.mxu1 %vm621_vm0, %v622_v1  ;;  %v436_v5 = vpack.c.bf16 %v74_v3, %v73_v2  ;;  %v77_v7 = vld [vmem:[#allocation8 + $0x20] sm:$0xff]  ;;  %v78_v8 = vld [vmem:[#allocation8 + $0x28] sm:$0xff]  ;;  %v439_v9 = vpack.c.bf16 %v76_v6, %v75_v4  ;;  %v79_v11 = vld [vmem:[#allocation8 + $0x30] sm:$0xff]  ;;  %v307_v32 = vand.u32 127, %v306_v31  ;;  %s625_s15 = smov 32   ;;  %s626_s16 = smov [#allocation10]  }
  0x4d   :  { %v430_v10 = vpack.c.bf16 %v78_v8, %v77_v7  ;;  %v80_v12 = vld [vmem:[#allocation8 + $0x38] sm:$0xff]  ;;  %v228_v13 = vld [vmem:[#allocation8 + $0x40] sm:$0xff]  ;;  %v229_v14 = vld [vmem:[#allocation8 + $0x48] sm:$0xff]  ;;  %s352_s17 = sshll.u32 %s626_s16, 4  ;;  %s353_s17 = int_to_ptr.vmem [resolvable:$true] %s352_s17 }
  0x4e   :  { %437 = vmatpush3.bf16.msra.mxu0 %v436_v5  ;;  %v433_v15 = vpack.c.bf16 %v80_v12, %v79_v11  ;;  %v70_v16 = vld [vmem:[#allocation2] sm:$0xff]  ;;  %v442_v17 = vpack.c.bf16 %v229_v14, %v228_v13  ;;  %v230_v18 = vld [vmem:[#allocation8 + $0x50] sm:$0xff]  ;;  %v231_v19 = vld [vmem:[#allocation8 + $0x58] sm:$0xff]  ;;  %vm308_vm2 = vcmp.lt.s32.totalorder %v307_v32, 96  ;;  %s560_s18 = scalar_lea.vmem %s353_s17, 128  ;;  %p565_p5 = scmp.lt.s32.totalorder %s353_s17, %s353_s17 }
  0x4f   :  { %438 = vmatprep.subr.bf16.mxu0 %v620_v0  ;;  %431 = vmatpush3.bf16.msra.mxu1 %v430_v10  ;;  %v71_v20 = vld [vmem:[#allocation5] sm:$0xff]  ;;  %v445_v21 = vpack.c.bf16 %v231_v19, %v230_v18  ;;  %v72_v22 = vld [vmem:[#allocation7] sm:$0xff]  ;;  %p561_p4 = scmp.ne.s32.totalorder %s353_s17, %s560_s18  ;;  %p566_p6 = scmp.lt.s32.totalorder %s560_s18, %s560_s18 }
  0x50   :  { %432 = vmatprep.subr.bf16.mxu1 %v620_v0 }
  0x51   :  { %p567_p7 = por %p566_p6, %p565_p5 }
  0x52   :  { %440 = vmatpush3.bf16.msra.mxu0 %v439_v9 }
  0x53   :  { %441 = vmatprep.subr.bf16.mxu0 %v620_v0  ;;  %434 = vmatpush3.bf16.msra.mxu1 %v433_v15  ;;  %p568_p8 = pnand %p567_p7, %p561_p4 }
  0x55   :  { %416 = vmatmul.mubr.msk.f32.vlgmr.msra.gmra.mrb[0].mxu0 %vm81_vm1, %v70_v16 }
  0x56   :  { %443 = vmatpush3.bf16.msra.mxu0 %v442_v17  ;;  %426 = vmatprep.mubr.msk.f32.mxu0 %vm621_vm0, %v622_v1 }
  0x57   :  { %444 = vmatprep.subr.bf16.mxu0 %v620_v0  ;;  %405 = vmatmul.mubr.msk.f32.vlgmr.msra.gmra.mrb[0].mxu1 %vm81_vm1, %v71_v20 }
  0x5a   :  { %446 = vmatpush3.bf16.msra.mxu0 %v445_v21 }
  0x5d   :  { %427 = vmatmul.mubr.msk.f32.vlgmr.msra.gmra.mrb[0].mxu0 %vm81_vm1, %v72_v22 }
 0x12a   :  { %v151_v23 = vpop.f32.mrb[0].mxu1 }
 0x12b   :  { %v406_v24 = vpop.f32.mrb[1].mxu1 }
 0x130   :  { %v301_v25 = vpop.f32.mrb[0].mxu0 }
 0x131   :  { %v447_v26 = vadd.f32 %v301_v25, %v151_v23  ;;  %v428_v27 = vpop.f32.mrb[1].mxu0 }
 0x133   :  { %v380_v28 = vmul.f32 -1.442695, %v447_v26 }
 0x135   :  { %464 = vpow2.f32 %v380_v28 }
 0x136   :  { %466 = vtanh.f32 %v447_v26 }
 0x13f   :  { %v465_v29 = vpop.eup %464 }
 0x140   :  { %v312_v30 = vadd.f32 1.0, %v465_v29  ;;  %v467_v33 = vpop.eup %466 }
 0x142   :  { %468 = vrcp.f32 %v312_v30 }
 0x14c   :  { %v469_v34 = vpop.eup %468 }
 0x14d   :  { %v316_v35 = vsel %vm308_vm2, %v469_v34, %v467_v33 }
 0x14e   :  { %319 = vrot.lane.b32.xlu0 %v316_v35, %s623_s3  ;;  %334 = vst [vmem:[#allocation10] sm:$0xff] %v316_v35  ;;  %v317_v38 = vmul.f32 %v316_v35, %v70_v16 }
 0x1c0   :  { %v320_v36 = vpop.permute.xlu0 %319 }
 0x1c1   :  { %v322_v37 = vmul.f32 %v320_v36, %v316_v35 }
 0x1c3   :  { %324 = vrot.lane.b32.xlu0 %v322_v37, %s624_s1 }
 0x235   :  { %v325_v39 = vpop.permute.xlu0 %324 }
 0x236   :  { %v327_v40 = vadd.f32 %v325_v39, %v317_v38 }
 0x238   :  { %470 = vtanh.f32 %v327_v40  ;;  %340 = vrot.lane.b32.xlu0 %v327_v40, %s625_s15 }
 0x242   :  { %v471_v41 = vpop.eup %470 }
 0x243   :  { %330 = vrot.lane.b32.xlu1 %v471_v41, %s623_s3 }
 0x244   :  { %571 = shalt.err (!%p568_p8)
}
 0x245   :  { %s572_s22 = scalar_lea.hbm %s751_s4, 128 }
 0x246   :  { %p573_p9 = scmp.ne.s32.totalorder %s751_s4, %s572_s22  ;;  %p576_p10 = scmp.lt.u32.totalorder %s572_s22, %s751_s4 }
 0x248   :  { %p578_p11 = pnand %p576_p10, %p573_p9 }
 0x24a   :  { %581 = shalt.err (!%p578_p11)
}
 0x24b   :  { %355 = dma.vmem_to_hbm [thread:$0]  %s353_s17, 128, %s751_s4, [#allocation4]   ;;  %vm344_vm3 = vcmask 523264  }
 0x24c   :  { %s627_s21 = smov [#allocation11]  }
 0x24d   :  { %s362_s28 = sshll.u32 %s627_s21, 4  ;;  %s363_s28 = int_to_ptr.vmem [resolvable:$true] %s362_s28 }
 0x24e   :  { %s582_s29 = scalar_lea.vmem %s363_s28, 128  ;;  %p587_p13 = scmp.lt.s32.totalorder %s363_s28, %s363_s28 }
 0x24f   :  { %p583_p12 = scmp.ne.s32.totalorder %s363_s28, %s582_s29  ;;  %p588_p0 = scmp.lt.s32.totalorder %s582_s29, %s582_s29 }
 0x251   :  { %p589_p1 = por %p588_p0, %p587_p13 }
 0x253   :  { %p590_p2 = pnand %p589_p1, %p583_p12 }
 0x2aa   :  { %v341_v44 = vpop.permute.xlu0 %340 }
 0x2b5   :  { %v331_v42 = vpop.permute.xlu1 %330 }
 0x2b6   :  { %v333_v43 = vmul.f32 %v331_v42, %v316_v35 }
 0x2b8   :  { %336 = vrot.lane.b32.xlu1 %v333_v43, %s623_s3 }
 0x32a   :  { %v337_v45 = vpop.permute.xlu1 %336 }
 0x32b   :  { %v343_v46 = vsel %vm81_vm1, %v337_v45, %v341_v44 }
 0x32c   :  { %345 = vst.msk [vmem:[#allocation11] sm:$0xff] %vm344_vm3, %v343_v46 }
 0x32d   :  { %593 = shalt.err (!%p590_p2)
}
 0x32e   :  { %s594_s6 = scalar_lea.hbm %s752_s5, 128 }
 0x32f   :  { %p595_p3 = scmp.ne.s32.totalorder %s752_s5, %s594_s6  ;;  %p598_p4 = scmp.lt.u32.totalorder %s594_s6, %s752_s5 }
 0x331   :  { %p600_p5 = pnand %p598_p4, %p595_p3 }
 0x333   :  { %603 = shalt.err (!%p600_p5)
}
 0x334   :  { %365 = dma.vmem_to_hbm [thread:$0]  %s363_s28, 128, %s752_s5, [#allocation12]  }
 0x335   :  { %610 = dma.done.wait [#allocation4], 128  }
 0x336   :  { %611 = vsyncadd [#allocation4], 4294967168 }
 0x337   :  { %612 = dma.done.wait [#allocation12], 128  }
 0x338   :  { %613 = vsyncadd [#allocation12], 4294967168 }
 0x339   :  { %372 = vsyncpa [#allocation3], 1 }
 0x33a   :  { %373 = vsyncpa [#allocation6], 1 }
 0x33b   :  { %374 = vsyncpa [#allocation9], 1 }
 0x33c   :  { %375 = vsyncpa [#allocation4], 1 }
 0x33d   :  { %376 = vsyncpa [#allocation12], 1 }

</bundles_post_ra>
